<compile_context>
chip_gen: v6e
topology: v6e:2x2x1
jax: 0.10.0
libtpu: 0.0.40
codegen_flags: <defaults>
</compile_context>

<pallas_src>
import functools

import jax
import jax.numpy as jnp
from jax.experimental import pallas as pl
from jax.experimental.pallas import tpu as pltpu

N_CLASS = 20
N_CLASS_PAD = 128            # lane-dense padded class dimension
D_IN, D_H1, D_H2 = 1024, 256, 64
NEG_BIG = -1e30              # finite "-inf" for pad-lane logits (no inf-inf NaN risk)


def _round_up(x, m):
    return ((x + m - 1) // m) * m


def _student_kernel(x_ref, w1_ref, b1_ref, w2_ref, b2_ref, w3_ref, b3_ref, o_ref):
    # x should arrive bf16 (contract of student_net_forward). Trace-time
    # fallback cast if a caller still feeds f32 (then the kernel stays correct
    # but pays the full f32 x HBM stream).
    x = x_ref[...]
    if x.dtype != jnp.bfloat16:
        x = x.astype(jnp.bfloat16)

    # fc1 + ReLU  (bf16 MXU matmul, f32 accumulate, f32 bias/ReLU)
    h1 = jnp.dot(x, w1_ref[...], preferred_element_type=jnp.float32) + b1_ref[...]
    h1 = jnp.maximum(h1, 0.0).astype(jnp.bfloat16)

    # fc2 + ReLU
    h2 = jnp.dot(h1, w2_ref[...], preferred_element_type=jnp.float32) + b2_ref[...]
    h2 = jnp.maximum(h2, 0.0).astype(jnp.bfloat16)

    # fc3 -> logits (tb, 128). Pad lanes: zero weight columns + -1e30 bias, so
    # after softmax their probability is exactly 0 and the 20 real classes
    # normalize exactly as in the unpadded model.
    logits = jnp.dot(h2, w3_ref[...], preferred_element_type=jnp.float32) + b3_ref[...]

    # Numerically stable softmax; exact division so every row sums to 1.
    m = jnp.max(logits, axis=-1, keepdims=True)
    e = jnp.exp(logits - m)
    denom = jnp.sum(e, axis=-1, keepdims=True)
    o_ref[...] = (e / denom).astype(o_ref.dtype)


@functools.partial(jax.jit, static_argnames=("tile_b",))
def student_net_forward(x, params, *, tile_b=2048):
    """x: (B, 1024), preferably bf16 (the kernel is HBM-bound on the x stream;
    produce bf16 upstream rather than casting in a wrapper). params: w1/w2 bf16
    (in,out); w3p (64,128) bf16 zero-padded; b1/b2 f32; b3p (1,128) f32 with
    -1e30 in the 108 pad lanes."""
    B = x.shape[0]
    w1, b1, w2, b2, w3p, b3p = (params[k] for k in ("w1", "b1", "w2", "b2", "w3p", "b3p"))

    # Batch tile: multiple of 8 (sublane granularity); aim for >=2 grid steps so
    # both v7x TensorCores get work (negligible extra per-step cost on v5e/v6e).
    tb = min(tile_b, max(8, _round_up(pl.cdiv(B, 2), 8)))
    bp = _round_up(B, tb)
    if bp != B:
        x = jnp.pad(x, ((0, bp - B), (0, 0)))
    grid = (bp // tb,)

    const = lambda i: (0, 0)  # weights/biases resident across the whole grid
    x_bytes = jnp.dtype(x.dtype).itemsize

    cost = pl.CostEstimate(
        flops=2 * bp * (D_IN * D_H1 + D_H1 * D_H2 + D_H2 * N_CLASS_PAD),
        transcendentals=bp * N_CLASS_PAD,
        bytes_accessed=(bp * D_IN * x_bytes + bp * N_CLASS_PAD * 4
                        + (D_IN * D_H1 + D_H1 * D_H2 + D_H2 * N_CLASS_PAD) * 2
                        + (D_H1 + D_H2 + N_CLASS_PAD) * 4),
    )

    out = pl.pallas_call(
        _student_kernel,
        out_shape=jax.ShapeDtypeStruct((bp, N_CLASS_PAD), jnp.float32),
        grid=grid,
        in_specs=[
            pl.BlockSpec((tb, D_IN), lambda i: (i, 0)),       # x: batch-tiled, double-buffered
            pl.BlockSpec((D_IN, D_H1), const),                # w1 (bf16)
            pl.BlockSpec((1, D_H1), const),                   # b1 (f32)
            pl.BlockSpec((D_H1, D_H2), const),                # w2 (bf16)
            pl.BlockSpec((1, D_H2), const),                   # b2 (f32)
            pl.BlockSpec((D_H2, N_CLASS_PAD), const),         # w3 padded (bf16)
            pl.BlockSpec((1, N_CLASS_PAD), const),            # b3 padded (f32)
        ],
        out_specs=pl.BlockSpec((tb, N_CLASS_PAD), lambda i: (i, 0)),
        compiler_params=pltpu.CompilerParams(
            dimension_semantics=("parallel",),                # megacore sharding on v7x
            vmem_limit_bytes=32 * 1024 * 1024,                # ~10 MiB used at tb=2048 w/ bf16 x; safe on v5e/v6e/v7x
        ),
        cost_estimate=cost,
    )(x, w1, b1, w2, b2, w3p, b3p)

    return out[:B, :N_CLASS]


def init_params(key):
    """Deterministic init. Weights stored (in, out) = transposed PyTorch layout, bf16.
    fc3 weight/bias are lane-padded 20 -> 128 (zero weights, -1e30 bias)."""
    k1, k2, k3 = jax.random.split(key, 3)
    w1 = (jax.random.normal(k1, (D_IN, D_H1), jnp.float32) / jnp.sqrt(D_IN)).astype(jnp.bfloat16)
    w2 = (jax.random.normal(k2, (D_H1, D_H2), jnp.float32) / jnp.sqrt(D_H1)).astype(jnp.bfloat16)
    w3 = (jax.random.normal(k3, (D_H2, N_CLASS), jnp.float32) / jnp.sqrt(D_H2)).astype(jnp.bfloat16)
    b1 = jnp.zeros((1, D_H1), jnp.float32)
    b2 = jnp.zeros((1, D_H2), jnp.float32)
    b3 = jnp.zeros((1, N_CLASS), jnp.float32)
    w3p = jnp.pad(w3, ((0, 0), (0, N_CLASS_PAD - N_CLASS)))
    b3p = jnp.pad(b3, ((0, 0), (0, N_CLASS_PAD - N_CLASS)), constant_values=NEG_BIG)
    return dict(w1=w1, b1=b1, w2=w2, b2=b2, w3p=w3p, b3p=b3p)


def _reference(x, p):
    """Full-f32 reference over the real 20 classes (weights/x up-cast)."""
    xf = x.astype(jnp.float32)
    h1 = jnp.maximum(xf @ p["w1"].astype(jnp.float32) + p["b1"], 0.0)
    h2 = jnp.maximum(h1 @ p["w2"].astype(jnp.float32) + p["b2"], 0.0)
    logits = h2 @ p["w3p"][:, :N_CLASS].astype(jnp.float32) + p["b3p"][:, :N_CLASS]
    return jax.nn.softmax(logits, axis=-1)


if __name__ == "__main__":
    key = jax.random.PRNGKey(0)
    kx, kp = jax.random.split(key)

    B = 8  # small batch; kernel tiles any batch size via the grid + padding
    # Contract: upstream produces bf16 activations (kernel is x-HBM-bound).
    x = jax.random.normal(kx, (B, D_IN), jnp.float32).astype(jnp.bfloat16)
    params = init_params(kp)

    out = student_net_forward(x, params)
    out = jax.block_until_ready(out)

    ref = _reference(x, params)
    assert out.shape == (B, N_CLASS)
    # bf16 matmuls / bf16 intermediates vs full-f32 reference.
    assert jnp.max(jnp.abs(out - ref)) < 5e-2, float(jnp.max(jnp.abs(out - ref)))
    # Exact normalization (plain division in the kernel).
    assert jnp.allclose(jnp.sum(out, axis=-1), 1.0, atol=1e-3), \
        float(jnp.max(jnp.abs(jnp.sum(out, axis=-1) - 1.0)))

    print("KERNEL_OK")
</pallas_src>

<mosaic_0001>
module attributes {stable_mosaic.version = 11 : i64} {
  func.func @_student_kernel(%arg0: i32, %arg1: memref<8x1024xbf16, #tpu.memory_space<vmem>>, %arg2: memref<1024x256xbf16, #tpu.memory_space<vmem>>, %arg3: memref<1x256xf32, #tpu.memory_space<vmem>>, %arg4: memref<256x64xbf16, #tpu.memory_space<vmem>>, %arg5: memref<1x64xf32, #tpu.memory_space<vmem>>, %arg6: memref<64x128xbf16, #tpu.memory_space<vmem>>, %arg7: memref<1x128xf32, #tpu.memory_space<vmem>>, %arg8: memref<8x128xf32, #tpu.memory_space<vmem>>) attributes {dimension_semantics = [#tpu.dimension_semantics<parallel>], iteration_bounds = array<i64: 1>, scalar_prefetch = 0 : i64, scratch_operands = 0 : i64, tpu.core_type = #tpu.core_type<tc>, window_params = [{transform_indices = @transform_0, window_bounds = array<i64: 8, 1024>}, {pipeline_mode = #tpu.pipeline_mode<synchronous>, transform_indices = @transform_1, window_bounds = array<i64: 1024, 256>}, {pipeline_mode = #tpu.pipeline_mode<synchronous>, transform_indices = @transform_2, window_bounds = array<i64: 1, 256>}, {pipeline_mode = #tpu.pipeline_mode<synchronous>, transform_indices = @transform_3, window_bounds = array<i64: 256, 64>}, {pipeline_mode = #tpu.pipeline_mode<synchronous>, transform_indices = @transform_4, window_bounds = array<i64: 1, 64>}, {pipeline_mode = #tpu.pipeline_mode<synchronous>, transform_indices = @transform_5, window_bounds = array<i64: 64, 128>}, {pipeline_mode = #tpu.pipeline_mode<synchronous>, transform_indices = @transform_6, window_bounds = array<i64: 1, 128>}, {transform_indices = @transform_7, window_bounds = array<i64: 8, 128>}]} {
    %c0 = arith.constant 0 : index
    %c0_0 = arith.constant 0 : index
    %0 = vector.load %arg1[%c0, %c0_0] : memref<8x1024xbf16, #tpu.memory_space<vmem>>, vector<8x1024xbf16>
    %c0_1 = arith.constant 0 : index
    %c0_2 = arith.constant 0 : index
    %1 = vector.load %arg2[%c0_1, %c0_2] : memref<1024x256xbf16, #tpu.memory_space<vmem>>, vector<1024x256xbf16>
    %cst = arith.constant dense<0.000000e+00> : vector<8x256xf32>
    %2 = tpu.matmul %0, %1, %cst {dimension_numbers = #tpu.dot_dimension_numbers<[1], [0], [0], [1], [0, 0, 1, 1], [], []>} : vector<8x1024xbf16>, vector<1024x256xbf16>, vector<8x256xf32> -> vector<8x256xf32>
    %c0_3 = arith.constant 0 : index
    %c0_4 = arith.constant 0 : index
    %3 = vector.load %arg3[%c0_3, %c0_4] : memref<1x256xf32, #tpu.memory_space<vmem>>, vector<1x256xf32>
    %4 = vector.broadcast %3 : vector<1x256xf32> to vector<8x256xf32>
    %5 = arith.addf %2, %4 : vector<8x256xf32>
    %cst_5 = arith.constant 0.000000e+00 : f32
    %6 = vector.broadcast %cst_5 : f32 to vector<8x256xf32>
    %7 = arith.maximumf %5, %6 : vector<8x256xf32>
    %8 = arith.truncf %7 : vector<8x256xf32> to vector<8x256xbf16>
    %c0_6 = arith.constant 0 : index
    %c0_7 = arith.constant 0 : index
    %9 = vector.load %arg4[%c0_6, %c0_7] : memref<256x64xbf16, #tpu.memory_space<vmem>>, vector<256x64xbf16>
    %cst_8 = arith.constant dense<0.000000e+00> : vector<8x64xf32>
    %10 = tpu.matmul %8, %9, %cst_8 {dimension_numbers = #tpu.dot_dimension_numbers<[1], [0], [0], [1], [0, 0, 1, 1], [], []>} : vector<8x256xbf16>, vector<256x64xbf16>, vector<8x64xf32> -> vector<8x64xf32>
    %c0_9 = arith.constant 0 : index
    %c0_10 = arith.constant 0 : index
    %11 = vector.load %arg5[%c0_9, %c0_10] : memref<1x64xf32, #tpu.memory_space<vmem>>, vector<1x64xf32>
    %12 = vector.broadcast %11 : vector<1x64xf32> to vector<8x64xf32>
    %13 = arith.addf %10, %12 : vector<8x64xf32>
    %cst_11 = arith.constant 0.000000e+00 : f32
    %14 = vector.broadcast %cst_11 : f32 to vector<8x64xf32>
    %15 = arith.maximumf %13, %14 : vector<8x64xf32>
    %16 = arith.truncf %15 : vector<8x64xf32> to vector<8x64xbf16>
    %c0_12 = arith.constant 0 : index
    %c0_13 = arith.constant 0 : index
    %17 = vector.load %arg6[%c0_12, %c0_13] : memref<64x128xbf16, #tpu.memory_space<vmem>>, vector<64x128xbf16>
    %cst_14 = arith.constant dense<0.000000e+00> : vector<8x128xf32>
    %18 = tpu.matmul %16, %17, %cst_14 {dimension_numbers = #tpu.dot_dimension_numbers<[1], [0], [0], [1], [0, 0, 1, 1], [], []>} : vector<8x64xbf16>, vector<64x128xbf16>, vector<8x128xf32> -> vector<8x128xf32>
    %c0_15 = arith.constant 0 : index
    %c0_16 = arith.constant 0 : index
    %19 = vector.load %arg7[%c0_15, %c0_16] : memref<1x128xf32, #tpu.memory_space<vmem>>, vector<1x128xf32>
    %20 = vector.broadcast %19 : vector<1x128xf32> to vector<8x128xf32>
    %21 = arith.addf %18, %20 : vector<8x128xf32>
    %cst_17 = arith.constant dense<0xFF800000> : vector<8xf32>
    %22 = vector.multi_reduction <maximumf>, %21, %cst_17 [1] : vector<8x128xf32> to vector<8xf32>
    %23 = vector.shape_cast %22 : vector<8xf32> to vector<8x1xf32>
    %24 = vector.broadcast %23 : vector<8x1xf32> to vector<8x128xf32>
    %25 = arith.subf %21, %24 : vector<8x128xf32>
    %26 = math.exp %25 : vector<8x128xf32>
    %cst_18 = arith.constant dense<0.000000e+00> : vector<8xf32>
    %27 = vector.multi_reduction <add>, %26, %cst_18 [1] : vector<8x128xf32> to vector<8xf32>
    %28 = vector.shape_cast %27 : vector<8xf32> to vector<8x1xf32>
    %29 = vector.broadcast %28 : vector<8x1xf32> to vector<8x128xf32>
    %30 = arith.divf %26, %29 : vector<8x128xf32>
    %c0_19 = arith.constant 0 : index
    %c0_20 = arith.constant 0 : index
    %31 = vector.load %arg8[%c0_19, %c0_20] : memref<8x128xf32, #tpu.memory_space<vmem>>, vector<8x128xf32>
    tpu.vector_store %arg8[%c0_19, %c0_20], %30 {strides = array<i32>} : memref<8x128xf32, #tpu.memory_space<vmem>>, vector<8x128xf32>,
    return
  }
  func.func @transform_0(%arg0: i32) -> (i32, i32) {
    %c0_i32 = arith.constant 0 : i32
    %c0_i32_0 = arith.constant 0 : i32
    return %arg0, %c0_i32 : i32, i32
  }
  func.func @transform_1(%arg0: i32) -> (i32, i32) {
    %c0_i32 = arith.constant 0 : i32
    %c0_i32_0 = arith.constant 0 : i32
    %c0_i32_1 = arith.constant 0 : i32
    return %c0_i32, %c0_i32_0 : i32, i32
  }
  func.func @transform_2(%arg0: i32) -> (i32, i32) {
    %c0_i32 = arith.constant 0 : i32
    %c0_i32_0 = arith.constant 0 : i32
    %c0_i32_1 = arith.constant 0 : i32
    return %c0_i32, %c0_i32_0 : i32, i32
  }
  func.func @transform_3(%arg0: i32) -> (i32, i32) {
    %c0_i32 = arith.constant 0 : i32
    %c0_i32_0 = arith.constant 0 : i32
    %c0_i32_1 = arith.constant 0 : i32
    return %c0_i32, %c0_i32_0 : i32, i32
  }
  func.func @transform_4(%arg0: i32) -> (i32, i32) {
    %c0_i32 = arith.constant 0 : i32
    %c0_i32_0 = arith.constant 0 : i32
    %c0_i32_1 = arith.constant 0 : i32
    return %c0_i32, %c0_i32_0 : i32, i32
  }
  func.func @transform_5(%arg0: i32) -> (i32, i32) {
    %c0_i32 = arith.constant 0 : i32
    %c0_i32_0 = arith.constant 0 : i32
    %c0_i32_1 = arith.constant 0 : i32
    return %c0_i32, %c0_i32_0 : i32, i32
  }
  func.func @transform_6(%arg0: i32) -> (i32, i32) {
    %c0_i32 = arith.constant 0 : i32
    %c0_i32_0 = arith.constant 0 : i32
    %c0_i32_1 = arith.constant 0 : i32
    return %c0_i32, %c0_i32_0 : i32, i32
  }
  func.func @transform_7(%arg0: i32) -> (i32, i32) {
    %c0_i32 = arith.constant 0 : i32
    %c0_i32_0 = arith.constant 0 : i32
    return %arg0, %c0_i32 : i32, i32
  }
}

</mosaic_0001>

<bundles_post_ra>
// kernel: student_net_forward.1
= control target key start
LH: loop header
LB: loop body
LE: loop exit
PB: predicated region body
PF: predicated region fallthrough
CT: control target
= control target key end

     0   :  { %12 = vsyncpa [#allocation3], 0  ;;  %s1924_s0 = inlined_call_operand.vmem [shape: bf16[8,1024], index: 0, kind: input, shape index: {}]   ;;  %s1925_s1 = inlined_call_operand.hbm [shape: bf16[1024,256], index: 1, kind: input, shape index: {}]   ;;  %s1926_s2 = inlined_call_operand.vmem [shape: f32[1,256], index: 2, kind: input, shape index: {}]   ;;  %s1927_s3 = inlined_call_operand.vmem [shape: bf16[256,64], index: 3, kind: input, shape index: {}]   ;;  %s1928_s4 = inlined_call_operand.vmem [shape: f32[1,64], index: 4, kind: input, shape index: {}]   ;;  %s1929_s5 = inlined_call_operand.vmem [shape: bf16[64,128], index: 5, kind: input, shape index: {}]   ;;  %s1930_s6 = inlined_call_operand.vmem [shape: f32[1,128], index: 6, kind: input, shape index: {}]   ;;  %s1931_s7 = inlined_call_operand.hbm [shape: f32[8,128], index: 7, kind: output, shape index: {}]  }
   0x1   :  { %13 = vsyncpa [#allocation4], 0  ;;  %s1779_s24 = smov [#allocation2]  }
   0x2   :  { %s21_s25 = sshll.u32 %s1779_s24, 4  ;;  %s22_s25 = int_to_ptr.vmem [resolvable:$true] %s21_s25 }
   0x3   :  { %s1743_s26 = scalar_lea.vmem %s22_s25, 16384  ;;  %p1748_p1 = scmp.lt.s32.totalorder %s22_s25, %s22_s25 }
   0x4   :  { %p1744_p0 = scmp.ne.s32.totalorder %s22_s25, %s1743_s26  ;;  %p1749_p2 = scmp.lt.s32.totalorder %s1743_s26, %s1743_s26 }
   0x6   :  { %p1750_p3 = por %p1749_p2, %p1748_p1 }
   0x8   :  { %p1751_p4 = pnand %p1750_p3, %p1744_p0 }
   0xa   :  { %1754 = shalt.err (!%p1751_p4)
}
   0xb   :  { %s1780_s27 = smov 128   ;;  %s1781_s28 = smov 8  }
   0xc   :  { %27 = dma.hbm_to_vmem [thread:$0]  %s1925_s1, 16384, %s22_s25, [#allocation3], %s1780_s27, %s1780_s27, %s1781_s28  }
   0xd   :  { %1775 = dma.done.wait [#allocation3], 16384  }
   0xe   :  { %1776 = vsyncadd [#allocation3], 4294950912  ;;  %v1511_v0 = vld [vmem:[#allocation2 + $0x74] ss:$8 sps:$4 sm:$0xff]   ;;  %v1515_v2 = vld [vmem:[#allocation2 + $0x70] ss:$8 sps:$4 sm:$0xff]  }
   0xf   :  { %v1513_v1 = vld [vmem:[#allocation2 + $0x174] ss:$8 sps:$4 sm:$0xff]   ;;  %854 = vmatprep.subr.bf16.mxu0 %v1511_v0  ;;  %v1516_v3 = vld [vmem:[#allocation2 + $0x170] ss:$8 sps:$4 sm:$0xff]   ;;  %v1517_v4 = vld [vmem:[#allocation2 + $0x64] ss:$8 sps:$4 sm:$0xff]  }
  0x10   :  { %895 = vmatprep.subr.bf16.mxu1 %v1513_v1  ;;  %855 = vmatpush1.bf16.msra.mxu0 %v1515_v2  ;;  %v1519_v5 = vld [vmem:[#allocation2 + $0x164] ss:$8 sps:$4 sm:$0xff]   ;;  %v1521_v6 = vld [vmem:[#allocation2 + $0x60] ss:$8 sps:$4 sm:$0xff]   ;;  %v1523_v8 = vld [vmem:[#allocation2 + $0x54] ss:$8 sps:$4 sm:$0xff]  }
  0x11   :  { %896 = vmatpush1.bf16.msra.mxu1 %v1516_v3  ;;  %856 = vmatprep.subr.bf16.mxu0 %v1517_v4  ;;  %v1522_v7 = vld [vmem:[#allocation2 + $0x160] ss:$8 sps:$4 sm:$0xff]   ;;  %v1525_v9 = vld [vmem:[#allocation2 + $0x154] ss:$8 sps:$4 sm:$0xff]   ;;  %v1527_v10 = vld [vmem:[#allocation2 + $0x50] ss:$8 sps:$4 sm:$0xff]  }
  0x12   :  { %897 = vmatprep.subr.bf16.mxu1 %v1519_v5  ;;  %v1528_v11 = vld [vmem:[#allocation2 + $0x150] ss:$8 sps:$4 sm:$0xff]   ;;  %v1529_v12 = vld [vmem:[#allocation2 + $0x44] ss:$8 sps:$4 sm:$0xff]   ;;  %v1533_v14 = vld [vmem:[#allocation2 + $0x40] ss:$8 sps:$4 sm:$0xff]  }
  0x13   :  { %v1531_v13 = vld [vmem:[#allocation2 + $0x144] ss:$8 sps:$4 sm:$0xff]   ;;  %v1534_v15 = vld [vmem:[#allocation2 + $0x140] ss:$8 sps:$4 sm:$0xff]   ;;  %v1535_v16 = vld [vmem:[#allocation2 + $0x34] ss:$8 sps:$4 sm:$0xff]  }
  0x14   :  { %857 = vmatpush1.bf16.msra.mxu0 %v1521_v6  ;;  %v1537_v17 = vld [vmem:[#allocation2 + $0x134] ss:$8 sps:$4 sm:$0xff]   ;;  %v1539_v18 = vld [vmem:[#allocation2 + $0x30] ss:$8 sps:$4 sm:$0xff]   ;;  %v1541_v20 = vld [vmem:[#allocation2 + $0x24] ss:$8 sps:$4 sm:$0xff]  }
  0x15   :  { %898 = vmatpush1.bf16.msra.mxu1 %v1522_v7  ;;  %858 = vmatprep.subr.bf16.mxu0 %v1523_v8  ;;  %v1540_v19 = vld [vmem:[#allocation2 + $0x130] ss:$8 sps:$4 sm:$0xff]   ;;  %v1543_v21 = vld [vmem:[#allocation2 + $0x124] ss:$8 sps:$4 sm:$0xff]   ;;  %v1545_v22 = vld [vmem:[#allocation2 + $0x20] ss:$8 sps:$4 sm:$0xff]  }
  0x16   :  { %899 = vmatprep.subr.bf16.mxu1 %v1525_v9  ;;  %v1546_v23 = vld [vmem:[#allocation2 + $0x120] ss:$8 sps:$4 sm:$0xff]   ;;  %v1547_v24 = vld [vmem:[#allocation2 + $0x14] ss:$8 sps:$4 sm:$0xff]   ;;  %v1551_v26 = vld [vmem:[#allocation2 + $0x10] ss:$8 sps:$4 sm:$0xff]  }
  0x17   :  { %v1549_v25 = vld [vmem:[#allocation2 + $0x114] ss:$8 sps:$4 sm:$0xff]   ;;  %v1552_v27 = vld [vmem:[#allocation2 + $0x110] ss:$8 sps:$4 sm:$0xff]   ;;  %v1553_v28 = vld [vmem:[#allocation2 + $0x4] ss:$8 sps:$4 sm:$0xff]  }
  0x18   :  { %859 = vmatpush1.bf16.msra.mxu0 %v1527_v10  ;;  %v1555_v29 = vld [vmem:[#allocation2 + $0x104] ss:$8 sps:$4 sm:$0xff]   ;;  %v1557_v30 = vld [vmem:[#allocation2] ss:$8 sps:$4 sm:$0xff]   ;;  %v1559_v32 = vld [vmem:[#allocation2 + $0xf4] ss:$8 sps:$4 sm:$0xff]  }
  0x19   :  { %900 = vmatpush1.bf16.msra.mxu1 %v1528_v11  ;;  %860 = vmatprep.subr.bf16.mxu0 %v1529_v12  ;;  %v1558_v31 = vld [vmem:[#allocation2 + $0x100] ss:$8 sps:$4 sm:$0xff]   ;;  %v1561_v33 = vld [vmem:[#allocation2 + $0x1f4] ss:$8 sps:$4 sm:$0xff]   ;;  %v1563_v34 = vld [vmem:[#allocation2 + $0xf0] ss:$8 sps:$4 sm:$0xff]  }
  0x1a   :  { %901 = vmatprep.subr.bf16.mxu1 %v1531_v13  ;;  %v1564_v35 = vld [vmem:[#allocation2 + $0x1f0] ss:$8 sps:$4 sm:$0xff]   ;;  %v1565_v36 = vld [vmem:[#allocation2 + $0xe4] ss:$8 sps:$4 sm:$0xff]   ;;  %v1569_v38 = vld [vmem:[#allocation2 + $0xe0] ss:$8 sps:$4 sm:$0xff]  }
  0x1b   :  { %v1567_v37 = vld [vmem:[#allocation2 + $0x1e4] ss:$8 sps:$4 sm:$0xff]   ;;  %v1570_v39 = vld [vmem:[#allocation2 + $0x1e0] ss:$8 sps:$4 sm:$0xff]   ;;  %v1571_v40 = vld [vmem:[#allocation2 + $0xd4] ss:$8 sps:$4 sm:$0xff]  }
  0x1c   :  { %861 = vmatpush1.bf16.msra.mxu0 %v1533_v14  ;;  %v1573_v41 = vld [vmem:[#allocation2 + $0x1d4] ss:$8 sps:$4 sm:$0xff]   ;;  %v1575_v42 = vld [vmem:[#allocation2 + $0xd0] ss:$8 sps:$4 sm:$0xff]   ;;  %v1577_v44 = vld [vmem:[#allocation2 + $0xc4] ss:$8 sps:$4 sm:$0xff]  }
  0x1d   :  { %902 = vmatpush1.bf16.msra.mxu1 %v1534_v15  ;;  %862 = vmatprep.subr.bf16.mxu0 %v1535_v16  ;;  %v1576_v43 = vld [vmem:[#allocation2 + $0x1d0] ss:$8 sps:$4 sm:$0xff]   ;;  %v1579_v45 = vld [vmem:[#allocation2 + $0x1c4] ss:$8 sps:$4 sm:$0xff]   ;;  %v1581_v49 = vld [vmem:[#allocation2 + $0xc0] ss:$8 sps:$4 sm:$0xff]  }
  0x1e   :  { %903 = vmatprep.subr.bf16.mxu1 %v1537_v17  ;;  %v42_v46 = vld [vmem:[%s1924_s0] sm:$0xff]  ;;  %v43_v48 = vld [vmem:[%s1924_s0 + $0x8] sm:$0xff]  ;;  %v1583_v52 = vld [vmem:[#allocation2 + $0xb4] ss:$8 sps:$4 sm:$0xff]   ;;  %vm1783_vm0 = vmmov 0   ;;  %vm1238_vm1 = vcmask 523264  }
  0x1f   :  { %v1308_v47 = vcombine.high %v42_v46, %v42_v46  ;;  %v1582_v50 = vld [vmem:[#allocation2 + $0x1c0] ss:$8 sps:$4 sm:$0xff]   ;;  %v1310_v51 = vcombine.high %v43_v48, %v43_v48  ;;  %v1585_v53 = vld [vmem:[#allocation2 + $0x1b4] ss:$8 sps:$4 sm:$0xff]   ;;  %v1587_v54 = vld [vmem:[#allocation2 + $0xb0] ss:$8 sps:$4 sm:$0xff]   ;;  %v1307_v6 = vcombine.low %v42_v46, %v42_v46  ;;  %v1309_v7 = vcombine.low %v43_v48, %v43_v48 }
  0x20   :  { %863 = vmatpush1.bf16.msra.mxu0 %v1539_v18  ;;  %v1588_v55 = vld [vmem:[#allocation2 + $0x1b0] ss:$8 sps:$4 sm:$0xff]   ;;  %v1589_v56 = vld [vmem:[#allocation2 + $0xa4] ss:$8 sps:$4 sm:$0xff]   ;;  %v1593_v58 = vld [vmem:[#allocation2 + $0xa0] ss:$8 sps:$4 sm:$0xff]  }
  0x21   :  { %904 = vmatpush1.bf16.msra.mxu1 %v1540_v19  ;;  %864 = vmatprep.subr.bf16.mxu0 %v1541_v20  ;;  %v1591_v57 = vld [vmem:[#allocation2 + $0x1a4] ss:$8 sps:$4 sm:$0xff]   ;;  %v1594_v59 = vld [vmem:[#allocation2 + $0x1a0] ss:$8 sps:$4 sm:$0xff]   ;;  %v1595_v60 = vld [vmem:[#allocation2 + $0x94] ss:$8 sps:$4 sm:$0xff]  }
  0x22   :  { %905 = vmatprep.subr.bf16.mxu1 %v1543_v21  ;;  %886 = vmatprep.mubr.bf16.mxu0 %v1308_v47  ;;  %v1597_v61 = vld [vmem:[#allocation2 + $0x194] ss:$8 sps:$4 sm:$0xff]   ;;  %v1599_v62 = vld [vmem:[#allocation2 + $0x90] ss:$8 sps:$4 sm:$0xff]   ;;  %v1601_v0 = vld [vmem:[#allocation2 + $0x84] ss:$8 sps:$4 sm:$0xff]  }
  0x23   :  { %927 = vmatprep.mubr.bf16.mxu1 %v1310_v51  ;;  %v1600_v63 = vld [vmem:[#allocation2 + $0x190] ss:$8 sps:$4 sm:$0xff]   ;;  %v1603_v1 = vld [vmem:[#allocation2 + $0x184] ss:$8 sps:$4 sm:$0xff]   ;;  %v1605_v2 = vld [vmem:[#allocation2 + $0x80] ss:$8 sps:$4 sm:$0xff]  }
  0x24   :  { %865 = vmatpush1.bf16.msra.mxu0 %v1545_v22  ;;  %v1606_v3 = vld [vmem:[#allocation2 + $0x180] ss:$8 sps:$4 sm:$0xff]   ;;  %v1613_v4 = vld [vmem:[#allocation2 + $0x274] ss:$8 sps:$4 sm:$0xff]   ;;  %v1611_v8 = vld [vmem:[#allocation2 + $0x270] ss:$8 sps:$4 sm:$0xff]  }
  0x25   :  { %906 = vmatpush1.bf16.msra.mxu1 %v1546_v23  ;;  %866 = vmatprep.subr.bf16.mxu0 %v1547_v24  ;;  %v1616_v5 = vld [vmem:[#allocation2 + $0x374] ss:$8 sps:$4 sm:$0xff]   ;;  %v1614_v9 = vld [vmem:[#allocation2 + $0x370] ss:$8 sps:$4 sm:$0xff]   ;;  %v1619_v10 = vld [vmem:[#allocation2 + $0x264] ss:$8 sps:$4 sm:$0xff]  }
  0x26   :  { %907 = vmatprep.subr.bf16.mxu1 %v1549_v25  ;;  %v1622_v11 = vld [vmem:[#allocation2 + $0x364] ss:$8 sps:$4 sm:$0xff]   ;;  %v1617_v12 = vld [vmem:[#allocation2 + $0x260] ss:$8 sps:$4 sm:$0xff]   ;;  %v1625_v14 = vld [vmem:[#allocation2 + $0x254] ss:$8 sps:$4 sm:$0xff]  }
  0x27   :  { %v1620_v13 = vld [vmem:[#allocation2 + $0x360] ss:$8 sps:$4 sm:$0xff]   ;;  %v1628_v15 = vld [vmem:[#allocation2 + $0x354] ss:$8 sps:$4 sm:$0xff]   ;;  %v1623_v16 = vld [vmem:[#allocation2 + $0x250] ss:$8 sps:$4 sm:$0xff]  }
  0x28   :  { %867 = vmatpush1.bf16.msra.mxu0 %v1551_v26  ;;  %v1626_v17 = vld [vmem:[#allocation2 + $0x350] ss:$8 sps:$4 sm:$0xff]   ;;  %v1631_v18 = vld [vmem:[#allocation2 + $0x244] ss:$8 sps:$4 sm:$0xff]   ;;  %v1629_v20 = vld [vmem:[#allocation2 + $0x240] ss:$8 sps:$4 sm:$0xff]  }
  0x29   :  { %908 = vmatpush1.bf16.msra.mxu1 %v1552_v27  ;;  %868 = vmatprep.subr.bf16.mxu0 %v1553_v28  ;;  %v1634_v19 = vld [vmem:[#allocation2 + $0x344] ss:$8 sps:$4 sm:$0xff]   ;;  %v1632_v21 = vld [vmem:[#allocation2 + $0x340] ss:$8 sps:$4 sm:$0xff]   ;;  %v1637_v22 = vld [vmem:[#allocation2 + $0x234] ss:$8 sps:$4 sm:$0xff]  }
  0x2a   :  { %909 = vmatprep.subr.bf16.mxu1 %v1555_v29  ;;  %v1640_v23 = vld [vmem:[#allocation2 + $0x334] ss:$8 sps:$4 sm:$0xff]   ;;  %v1635_v24 = vld [vmem:[#allocation2 + $0x230] ss:$8 sps:$4 sm:$0xff]   ;;  %v1643_v26 = vld [vmem:[#allocation2 + $0x224] ss:$8 sps:$4 sm:$0xff]  }
  0x2b   :  { %v1638_v25 = vld [vmem:[#allocation2 + $0x330] ss:$8 sps:$4 sm:$0xff]   ;;  %v1646_v27 = vld [vmem:[#allocation2 + $0x324] ss:$8 sps:$4 sm:$0xff]   ;;  %v1641_v28 = vld [vmem:[#allocation2 + $0x220] ss:$8 sps:$4 sm:$0xff]  }
  0x2c   :  { %869 = vmatpush1.bf16.msra.mxu0 %v1557_v30  ;;  %v1644_v29 = vld [vmem:[#allocation2 + $0x320] ss:$8 sps:$4 sm:$0xff]   ;;  %v1649_v30 = vld [vmem:[#allocation2 + $0x214] ss:$8 sps:$4 sm:$0xff]   ;;  %v1667_v46 = vld [vmem:[#allocation2 + $0x2e4] ss:$8 sps:$4 sm:$0xff]  }
  0x2d   :  { %910 = vmatpush1.bf16.msra.mxu1 %v1558_v31  ;;  %870 = vmatprep.subr.bf16.mxu0 %v1559_v32  ;;  %v1652_v31 = vld [vmem:[#allocation2 + $0x314] ss:$8 sps:$4 sm:$0xff]   ;;  %v1647_v32 = vld [vmem:[#allocation2 + $0x210] ss:$8 sps:$4 sm:$0xff]   ;;  %v1670_v47 = vld [vmem:[#allocation2 + $0x3e4] ss:$8 sps:$4 sm:$0xff]  }
  0x2e   :  { %911 = vmatprep.subr.bf16.mxu1 %v1561_v33  ;;  %v1650_v33 = vld [vmem:[#allocation2 + $0x310] ss:$8 sps:$4 sm:$0xff]   ;;  %v1665_v48 = vld [vmem:[#allocation2 + $0x2e0] ss:$8 sps:$4 sm:$0xff]   ;;  %v1676_v51 = vld [vmem:[#allocation2 + $0x3d4] ss:$8 sps:$4 sm:$0xff]  }
  0x30   :  { %871 = vmatpush2.bf16.msra.mxu0 %v1563_v34  ;;  %v1837_v34 = vld [vmem:[%s1924_s0 + $0x10] sm:$0xff] }
  0x31   :  { %912 = vmatpush2.bf16.msra.mxu1 %v1564_v35  ;;  %872 = vmatprep.subr.bf16.mxu0 %v1565_v36  ;;  %v1842_v35 = vld [vmem:[%s1924_s0 + $0x18] sm:$0xff]  ;;  %v1655_v36 = vld [vmem:[#allocation2 + $0x204] ss:$8 sps:$4 sm:$0xff]  }
  0x32   :  { %913 = vmatprep.subr.bf16.mxu1 %v1567_v37  ;;  %v1658_v37 = vld [vmem:[#allocation2 + $0x304] ss:$8 sps:$4 sm:$0xff]  }
  0x34   :  { %873 = vmatpush2.bf16.msra.mxu0 %v1569_v38  ;;  %v1312_v38 = vcombine.high %v1837_v34, %v1837_v34 }
  0x35   :  { %914 = vmatpush2.bf16.msra.mxu1 %v1570_v39  ;;  %874 = vmatprep.subr.bf16.mxu0 %v1571_v40  ;;  %v1314_v39 = vcombine.high %v1842_v35, %v1842_v35  ;;  %v1653_v40 = vld [vmem:[#allocation2 + $0x200] ss:$8 sps:$4 sm:$0xff]  }
  0x36   :  { %915 = vmatprep.subr.bf16.mxu1 %v1573_v41  ;;  %v1656_v41 = vld [vmem:[#allocation2 + $0x300] ss:$8 sps:$4 sm:$0xff]  }
  0x38   :  { %875 = vmatpush2.bf16.msra.mxu0 %v1575_v42  ;;  %v1661_v42 = vld [vmem:[#allocation2 + $0x2f4] ss:$8 sps:$4 sm:$0xff]  }
  0x39   :  { %916 = vmatpush2.bf16.msra.mxu1 %v1576_v43  ;;  %876 = vmatprep.subr.bf16.mxu0 %v1577_v44  ;;  %v1664_v43 = vld [vmem:[#allocation2 + $0x3f4] ss:$8 sps:$4 sm:$0xff]   ;;  %v1659_v44 = vld [vmem:[#allocation2 + $0x2f0] ss:$8 sps:$4 sm:$0xff]  }
  0x3a   :  { %917 = vmatprep.subr.bf16.mxu1 %v1579_v45  ;;  %v1662_v45 = vld [vmem:[#allocation2 + $0x3f0] ss:$8 sps:$4 sm:$0xff]  }
  0x3c   :  { %877 = vmatpush2.bf16.msra.mxu0 %v1581_v49  ;;  %v1668_v49 = vld [vmem:[#allocation2 + $0x3e0] ss:$8 sps:$4 sm:$0xff]  }
  0x3d   :  { %918 = vmatpush2.bf16.msra.mxu1 %v1582_v50  ;;  %878 = vmatprep.subr.bf16.mxu0 %v1583_v52  ;;  %v1673_v50 = vld [vmem:[#allocation2 + $0x2d4] ss:$8 sps:$4 sm:$0xff]   ;;  %v1671_v52 = vld [vmem:[#allocation2 + $0x2d0] ss:$8 sps:$4 sm:$0xff]  }
  0x3e   :  { %919 = vmatprep.subr.bf16.mxu1 %v1585_v53  ;;  %v1674_v53 = vld [vmem:[#allocation2 + $0x3d0] ss:$8 sps:$4 sm:$0xff]  }
  0x40   :  { %879 = vmatpush2.bf16.msra.mxu0 %v1587_v54  ;;  %v1679_v54 = vld [vmem:[#allocation2 + $0x2c4] ss:$8 sps:$4 sm:$0xff]  }
  0x41   :  { %920 = vmatpush2.bf16.msra.mxu1 %v1588_v55  ;;  %880 = vmatprep.subr.bf16.mxu0 %v1589_v56  ;;  %v1682_v55 = vld [vmem:[#allocation2 + $0x3c4] ss:$8 sps:$4 sm:$0xff]   ;;  %v1677_v56 = vld [vmem:[#allocation2 + $0x2c0] ss:$8 sps:$4 sm:$0xff]  }
  0x42   :  { %921 = vmatprep.subr.bf16.mxu1 %v1591_v57  ;;  %v1680_v57 = vld [vmem:[#allocation2 + $0x3c0] ss:$8 sps:$4 sm:$0xff]  }
  0x44   :  { %881 = vmatpush2.bf16.msra.mxu0 %v1593_v58  ;;  %v1685_v58 = vld [vmem:[#allocation2 + $0x2b4] ss:$8 sps:$4 sm:$0xff]  }
  0x45   :  { %922 = vmatpush2.bf16.msra.mxu1 %v1594_v59  ;;  %882 = vmatprep.subr.bf16.mxu0 %v1595_v60  ;;  %v1688_v59 = vld [vmem:[#allocation2 + $0x3b4] ss:$8 sps:$4 sm:$0xff]   ;;  %v1683_v60 = vld [vmem:[#allocation2 + $0x2b0] ss:$8 sps:$4 sm:$0xff]  }
  0x46   :  { %923 = vmatprep.subr.bf16.mxu1 %v1597_v61  ;;  %v1686_v61 = vld [vmem:[#allocation2 + $0x3b0] ss:$8 sps:$4 sm:$0xff]  }
  0x48   :  { %883 = vmatpush2.bf16.msra.mxu0 %v1599_v62  ;;  %v1691_v62 = vld [vmem:[#allocation2 + $0x2a4] ss:$8 sps:$4 sm:$0xff]  }
  0x49   :  { %924 = vmatpush2.bf16.msra.mxu1 %v1600_v63  ;;  %884 = vmatprep.subr.bf16.mxu0 %v1601_v0  ;;  %v1694_v63 = vld [vmem:[#allocation2 + $0x3a4] ss:$8 sps:$4 sm:$0xff]   ;;  %v1689_v0 = vld [vmem:[#allocation2 + $0x2a0] ss:$8 sps:$4 sm:$0xff]  }
  0x4a   :  { %925 = vmatprep.subr.bf16.mxu1 %v1603_v1  ;;  %v1692_v1 = vld [vmem:[#allocation2 + $0x3a0] ss:$8 sps:$4 sm:$0xff]  }
  0x4c   :  { %885 = vmatpush2.bf16.msra.mxu0 %v1605_v2  ;;  %v1697_v2 = vld [vmem:[#allocation2 + $0x294] ss:$8 sps:$4 sm:$0xff]  }
  0x4d   :  { %926 = vmatpush2.bf16.msra.mxu1 %v1606_v3  ;;  %936 = vmatprep.subr.bf16.mxu0 %v1613_v4  ;;  %v1700_v3 = vld [vmem:[#allocation2 + $0x394] ss:$8 sps:$4 sm:$0xff]   ;;  %v1695_v4 = vld [vmem:[#allocation2 + $0x290] ss:$8 sps:$4 sm:$0xff]  }
  0x4e   :  { %977 = vmatprep.subr.bf16.mxu1 %v1616_v5  ;;  %v1698_v5 = vld [vmem:[#allocation2 + $0x390] ss:$8 sps:$4 sm:$0xff]  }
  0x4f   :  { %887 = vmatmul.mubr.bf16.vlgmr.msra.gmra.mxu0 %v1307_v6  ;;  %v1703_v6 = vld [vmem:[#allocation2 + $0x284] ss:$8 sps:$4 sm:$0xff]  }
  0x50   :  { %928 = vmatmul.mubr.bf16.vlgmr.msra.gmra.mxu1 %v1309_v7  ;;  %937 = vmatpush1.bf16.msra.mxu0 %v1611_v8  ;;  %v1706_v7 = vld [vmem:[#allocation2 + $0x384] ss:$8 sps:$4 sm:$0xff]   ;;  %v1701_v8 = vld [vmem:[#allocation2 + $0x280] ss:$8 sps:$4 sm:$0xff]  }
  0x51   :  { %978 = vmatpush1.bf16.msra.mxu1 %v1614_v9  ;;  %938 = vmatprep.subr.bf16.mxu0 %v1619_v10  ;;  %v1704_v9 = vld [vmem:[#allocation2 + $0x380] ss:$8 sps:$4 sm:$0xff]   ;;  %v1311_v10 = vcombine.low %v1837_v34, %v1837_v34 }
  0x52   :  { %979 = vmatprep.subr.bf16.mxu1 %v1622_v11  ;;  %968 = vmatprep.mubr.bf16.mxu0 %v1312_v38  ;;  %v1313_v11 = vcombine.low %v1842_v35, %v1842_v35  ;;  %v176_v38 = vlaneseq }
  0x53   :  { %1009 = vmatprep.mubr.bf16.mxu1 %v1314_v39 }
  0x54   :  { %939 = vmatpush1.bf16.msra.mxu0 %v1617_v12  ;;  %v1711_v12 = vld [vmem:[%s1927_s3 + $0x78] sm:$0xff]   ;;  %v177_v39 = vshrl.u32 %v176_v38, 7 }
  0x55   :  { %980 = vmatpush1.bf16.msra.mxu1 %v1620_v13  ;;  %940 = vmatprep.subr.bf16.mxu0 %v1625_v14  ;;  %v1712_v13 = vld [vmem:[%s1927_s3 + $0x38] sm:$0xff]   ;;  %v1713_v14 = vld [vmem:[%s1927_s3 + $0x70] sm:$0xff]  }
  0x56   :  { %981 = vmatprep.subr.bf16.mxu1 %v1628_v15  ;;  %v1714_v15 = vld [vmem:[%s1927_s3 + $0x30] sm:$0xff]  }
  0x58   :  { %941 = vmatpush1.bf16.msra.mxu0 %v1623_v16  ;;  %v1715_v16 = vld [vmem:[%s1927_s3 + $0x68] sm:$0xff]  }
  0x59   :  { %982 = vmatpush1.bf16.msra.mxu1 %v1626_v17  ;;  %942 = vmatprep.subr.bf16.mxu0 %v1631_v18  ;;  %v1716_v17 = vld [vmem:[%s1927_s3 + $0x28] sm:$0xff]   ;;  %v1717_v18 = vld [vmem:[%s1927_s3 + $0x60] sm:$0xff]  }
  0x5a   :  { %983 = vmatprep.subr.bf16.mxu1 %v1634_v19  ;;  %v1718_v19 = vld [vmem:[%s1927_s3 + $0x20] sm:$0xff]  }
  0x5c   :  { %943 = vmatpush1.bf16.msra.mxu0 %v1629_v20  ;;  %v1719_v20 = vld [vmem:[%s1927_s3 + $0x58] sm:$0xff]  }
  0x5d   :  { %984 = vmatpush1.bf16.msra.mxu1 %v1632_v21  ;;  %944 = vmatprep.subr.bf16.mxu0 %v1637_v22  ;;  %v1720_v21 = vld [vmem:[%s1927_s3 + $0x18] sm:$0xff]   ;;  %v1721_v22 = vld [vmem:[%s1927_s3 + $0x50] sm:$0xff]  }
  0x5e   :  { %985 = vmatprep.subr.bf16.mxu1 %v1640_v23  ;;  %v1722_v23 = vld [vmem:[%s1927_s3 + $0x10] sm:$0xff]  }
  0x60   :  { %945 = vmatpush1.bf16.msra.mxu0 %v1635_v24  ;;  %v1723_v24 = vld [vmem:[%s1927_s3 + $0x48] sm:$0xff]  }
  0x61   :  { %986 = vmatpush1.bf16.msra.mxu1 %v1638_v25  ;;  %946 = vmatprep.subr.bf16.mxu0 %v1643_v26  ;;  %v1724_v25 = vld [vmem:[%s1927_s3 + $0x8] sm:$0xff]   ;;  %v1725_v26 = vld [vmem:[%s1927_s3 + $0x40] sm:$0xff]  }
  0x62   :  { %987 = vmatprep.subr.bf16.mxu1 %v1646_v27  ;;  %v1726_v27 = vld [vmem:[%s1927_s3] sm:$0xff]  }
  0x64   :  { %947 = vmatpush1.bf16.msra.mxu0 %v1641_v28  ;;  %v1727_v28 = vld [vmem:[%s1929_s5 + $0x18] sm:$0xff]  }
  0x65   :  { %988 = vmatpush1.bf16.msra.mxu1 %v1644_v29  ;;  %948 = vmatprep.subr.bf16.mxu0 %v1649_v30  ;;  %v1782_v29 = vmov 0.0  }
  0x66   :  { %989 = vmatprep.subr.bf16.mxu1 %v1652_v31 }
  0x68   :  { %949 = vmatpush1.bf16.msra.mxu0 %v1647_v32 }
  0x69   :  { %990 = vmatpush1.bf16.msra.mxu1 %v1650_v33  ;;  %950 = vmatprep.subr.bf16.mxu0 %v1655_v36 }
  0x6a   :  { %991 = vmatprep.subr.bf16.mxu1 %v1658_v37 }
  0x6c   :  { %951 = vmatpush1.bf16.msra.mxu0 %v1653_v40  ;;  %v178_v40 = vsub.s32 0, %v177_v39 }
  0x6d   :  { %992 = vmatpush1.bf16.msra.mxu1 %v1656_v41  ;;  %952 = vmatprep.subr.bf16.mxu0 %v1661_v42  ;;  %v174_v41 = vld [vmem:[%s1926_s2] sm:$0x3]  ;;  %v182_v42 = vsub.s32 1, %v177_v39 }
  0x6e   :  { %993 = vmatprep.subr.bf16.mxu1 %v1664_v43  ;;  %v179_v43 = vrot.slane %v174_v41, %v178_v40 }
  0x70   :  { %953 = vmatpush2.bf16.msra.mxu0 %v1659_v44  ;;  %v183_v44 = vrot.slane %v174_v41, %v182_v42 }
  0x71   :  { %994 = vmatpush2.bf16.msra.mxu1 %v1662_v45  ;;  %954 = vmatprep.subr.bf16.mxu0 %v1667_v46 }
  0x72   :  { %995 = vmatprep.subr.bf16.mxu1 %v1670_v47 }
  0x74   :  { %955 = vmatpush2.bf16.msra.mxu0 %v1665_v48 }
  0x75   :  { %996 = vmatpush2.bf16.msra.mxu1 %v1668_v49  ;;  %956 = vmatprep.subr.bf16.mxu0 %v1673_v50 }
  0x76   :  { %997 = vmatprep.subr.bf16.mxu1 %v1676_v51 }
  0x78   :  { %957 = vmatpush2.bf16.msra.mxu0 %v1671_v52 }
  0x79   :  { %998 = vmatpush2.bf16.msra.mxu1 %v1674_v53  ;;  %958 = vmatprep.subr.bf16.mxu0 %v1679_v54 }
  0x7a   :  { %999 = vmatprep.subr.bf16.mxu1 %v1682_v55 }
  0x7c   :  { %959 = vmatpush2.bf16.msra.mxu0 %v1677_v56 }
  0x7d   :  { %1000 = vmatpush2.bf16.msra.mxu1 %v1680_v57  ;;  %960 = vmatprep.subr.bf16.mxu0 %v1685_v58 }
  0x7e   :  { %1001 = vmatprep.subr.bf16.mxu1 %v1688_v59 }
  0x80   :  { %961 = vmatpush2.bf16.msra.mxu0 %v1683_v60 }
  0x81   :  { %1002 = vmatpush2.bf16.msra.mxu1 %v1686_v61  ;;  %962 = vmatprep.subr.bf16.mxu0 %v1691_v62 }
  0x82   :  { %1003 = vmatprep.subr.bf16.mxu1 %v1694_v63 }
  0x84   :  { %963 = vmatpush2.bf16.msra.mxu0 %v1689_v0 }
  0x85   :  { %1004 = vmatpush2.bf16.msra.mxu1 %v1692_v1  ;;  %964 = vmatprep.subr.bf16.mxu0 %v1697_v2  ;;  %v1728_v1 = vld [vmem:[%s1929_s5 + $0x10] sm:$0xff]   ;;  %v1729_v2 = vld [vmem:[%s1929_s5 + $0x8] sm:$0xff]  }
  0x86   :  { %1005 = vmatprep.subr.bf16.mxu1 %v1700_v3  ;;  %v1730_v3 = vld [vmem:[%s1929_s5] sm:$0xff]  }
  0x88   :  { %965 = vmatpush2.bf16.msra.mxu0 %v1695_v4 }
  0x89   :  { %1006 = vmatpush2.bf16.msra.mxu1 %v1698_v5  ;;  %966 = vmatprep.subr.bf16.mxu0 %v1703_v6  ;;  %v1443_v5 = vld [vmem:[%s1928_s4] ss:$0 sm:$0xff]  ;;  %s1784_s4 = smov [#allocation5]  }
  0x8a   :  { %1007 = vmatprep.subr.bf16.mxu1 %v1706_v7  ;;  %s1298_s5 = sshll.u32 %s1784_s4, 4  ;;  %s1299_s5 = int_to_ptr.vmem [resolvable:$true] %s1298_s5 }
  0x8b   :  { %p1760_p6 = scmp.lt.s32.totalorder %s1299_s5, %s1299_s5 }
  0x8c   :  { %967 = vmatpush2.bf16.msra.mxu0 %v1701_v8 }
  0x8d   :  { %1008 = vmatpush2.bf16.msra.mxu1 %v1704_v9  ;;  %1466 = vmatprep.subr.bf16.mxu0 %v1711_v12 }
  0x8e   :  { %1493 = vmatprep.subr.bf16.mxu1 %v1782_v29 }
  0x8f   :  { %969 = vmatmul.mubr.bf16.vlgmr.msra.gmra.mxu0 %v1311_v10 }
  0x90   :  { %1010 = vmatmul.mubr.bf16.vlgmr.msra.gmra.mxu1 %v1313_v11  ;;  %1467 = vmatpush3.bf16.msra.mxu0 %v1712_v13  ;;  %v1460_v13 = vld [vmem:[%s1930_s6] ss:$0 sm:$0xff]  ;;  %s1755_s6 = scalar_lea.vmem %s1299_s5, 128 }
  0x91   :  { %1468 = vmatprep.subr.bf16.mxu0 %v1713_v14  ;;  %1494 = vmatpush3.bf16.msra.mxu1 %v1727_v28  ;;  %p1756_p5 = scmp.ne.s32.totalorder %s1299_s5, %s1755_s6  ;;  %p1761_p7 = scmp.lt.s32.totalorder %s1755_s6, %s1755_s6 }
  0x92   :  { %1495 = vmatprep.subr.bf16.mxu1 %v1782_v29  ;;  %1501 = vmatprep.mubr.msk.bf16.mxu1 %vm1783_vm0, %v1782_v29 }
  0x93   :  { %p1762_p8 = por %p1761_p7, %p1760_p6 }
  0x94   :  { %1469 = vmatpush3.bf16.msra.mxu0 %v1714_v15 }
  0x95   :  { %1470 = vmatprep.subr.bf16.mxu0 %v1715_v16  ;;  %1496 = vmatpush3.bf16.msra.mxu1 %v1728_v1  ;;  %p1763_p9 = pnand %p1762_p8, %p1756_p5 }
  0x96   :  { %1497 = vmatprep.subr.bf16.mxu1 %v1782_v29 }
  0x98   :  { %1471 = vmatpush3.bf16.msra.mxu0 %v1716_v17 }
  0x99   :  { %1472 = vmatprep.subr.bf16.mxu0 %v1717_v18  ;;  %1498 = vmatpush3.bf16.msra.mxu1 %v1729_v2 }
  0x9a   :  { %1499 = vmatprep.subr.bf16.mxu1 %v1782_v29 }
  0x9c   :  { %1473 = vmatpush3.bf16.msra.mxu0 %v1718_v19 }
  0x9d   :  { %1474 = vmatprep.subr.bf16.mxu0 %v1719_v20  ;;  %1500 = vmatpush3.bf16.msra.mxu1 %v1730_v3 }
  0xa0   :  { %1475 = vmatpush3.bf16.msra.mxu0 %v1720_v21 }
  0xa1   :  { %1476 = vmatprep.subr.bf16.mxu0 %v1721_v22 }
  0xa4   :  { %1477 = vmatpush3.bf16.msra.mxu0 %v1722_v23 }
  0xa5   :  { %1478 = vmatprep.subr.bf16.mxu0 %v1723_v24 }
  0xa8   :  { %1479 = vmatpush3.bf16.msra.mxu0 %v1724_v25 }
  0xa9   :  { %1480 = vmatprep.subr.bf16.mxu0 %v1725_v26 }
  0xac   :  { %1481 = vmatpush3.bf16.msra.mxu0 %v1726_v27 }
 0x10f   :  { %v888_v30 = vpop.f32.mrf.mxu0 }
 0x110   :  { %v929_v31 = vpop.f32.mrf.mxu1  ;;  %v889_v45 = vadd.f32 %v888_v30, %v179_v43 }
 0x111   :  { %v890_v32 = vpop.f32.mrf.mxu0 }
 0x112   :  { %v931_v33 = vpop.f32.mrf.mxu1  ;;  %v891_v46 = vadd.f32 %v890_v32, %v183_v44  ;;  %v930_v47 = vadd.f32 %v929_v31, %v889_v45 }
 0x113   :  { %v892_v34 = vpop.f32.mrf.mxu0 }
 0x114   :  { %v933_v35 = vpop.f32.mrf.mxu1  ;;  %v932_v50 = vadd.f32 %v931_v33, %v891_v46 }
 0x115   :  { %v893_v36 = vpop.f32.mrf.mxu0 }
 0x116   :  { %v934_v37 = vpop.f32.mrf.mxu1 }
 0x14f   :  { %v970_v48 = vpop.f32.mrf.mxu0 }
 0x150   :  { %v1011_v49 = vpop.f32.mrf.mxu1  ;;  %v971_v51 = vadd.f32 %v970_v48, %v930_v47 }
 0x151   :  { %v972_v52 = vpop.f32.mrf.mxu0 }
 0x152   :  { %v1013_v53 = vpop.f32.mrf.mxu1  ;;  %v1012_v54 = vadd.f32 %v1011_v49, %v971_v51  ;;  %v973_v55 = vadd.f32 %v972_v52, %v932_v50 }
 0x153   :  { %v974_v56 = vpop.f32.mrf.mxu0 }
 0x154   :  { %v1015_v57 = vpop.f32.mrf.mxu1  ;;  %v1014_v58 = vadd.f32 %v1013_v53, %v973_v55  ;;  %v1018_v59 = vmax.f32 %v1012_v54, 0.0 }
 0x155   :  { %v975_v60 = vpop.f32.mrf.mxu0 }
 0x156   :  { %v1016_v61 = vpop.f32.mrf.mxu1  ;;  %v1019_v62 = vmax.f32 %v1014_v58, 0.0  ;;  %v1020_v0 = vpack.c.bf16 %v1018_v59, %v1018_v59 }
 0x158   :  { %v1021_v63 = vpack.c.bf16 %v1019_v62, %v1019_v62 }
 0x15a   :  { %1189 = vmatprep.mubr.bf16.mxu0 %v1021_v63 }
 0x15b   :  { %1190 = vmatmul.mubr.bf16.vlgmr.msra.gmra.mxu0 %v1020_v0 }
 0x21b   :  { %v1482_v4 = vpop.f32.mrf.mxu0 }
 0x21d   :  { %v1483_v6 = vpop.f32.mrf.mxu0 }
 0x21e   :  { %v1484_v7 = vadd.f32 %v1483_v6, %v1482_v4 }
 0x21f   :  { %v1485_v8 = vpop.f32.mrf.mxu0 }
 0x220   :  { %v1192_v9 = vadd.f32 %v1484_v7, %v1443_v5 }
 0x221   :  { %v1486_v10 = vpop.f32.mrf.mxu0 }
 0x222   :  { %v1197_v11 = vmax.f32 %v1192_v9, 0.0 }
 0x224   :  { %v1198_v12 = vpack.c.bf16 %v1197_v11, %v1197_v11 }
 0x226   :  { %1502 = vmatmul.mubr.msk.bf16.vlgmr.msra.gmra.mxu1 %vm1238_vm1, %v1198_v12 }
 0x2e6   :  { %v1276_v14 = vpop.f32.mrf.mxu1 }
 0x2e7   :  { %v1277_v15 = vadd.f32 %v1460_v13, %v1276_v14 }
 0x2e8   :  { %v1503_v16 = vpop.f32.mrf.mxu1 }
 0x2e9   :  { %1282 = vmax.xlane.f32.xlu0 %v1277_v15 }
 0x2ea   :  { %v1279_v17 = vpop.f32.mrf.mxu1 }
 0x2ec   :  { %v1504_v18 = vpop.f32.mrf.mxu1 }
 0x372   :  { %v1283_v19 = vpop.xlane.xlu0 %1282 }
 0x373   :  { %v1284_v20 = vsub.f32 %v1277_v15, %v1283_v19 }
 0x375   :  { %v1285_v21 = vmul.f32 1.442695, %v1284_v20 }
 0x377   :  { %1731 = vpow2.f32 %v1285_v21 }
 0x384   :  { %v1732_v22 = vpop.eup %1731 }
 0x385   :  { %1287 = vadd.xlane.f32.xlu0 %v1732_v22 }
 0x40e   :  { %v1288_v23 = vpop.xlane.xlu0 %1287 }
 0x40f   :  { %1733 = vrcp.f32 %v1288_v23 }
 0x41c   :  { %v1734_v24 = vpop.eup %1733 }
 0x41d   :  { %v1290_v25 = vmul.f32 %v1734_v24, %v1732_v22 }
 0x41f   :  { %1291 = vst [vmem:[#allocation5] sm:$0xff] %v1290_v25 }
 0x420   :  { %1766 = shalt.err (!%p1763_p9)
}
 0x421   :  { %1301 = dma.vmem_to_hbm [thread:$0]  %s1299_s5, 128, %s1931_s7, [#allocation4]  }
 0x422   :  { %1777 = dma.done.wait [#allocation4], 128  }
 0x423   :  { %1778 = vsyncadd [#allocation4], 4294967168 }
 0x424   :  { %1305 = vsyncpa [#allocation3], 1 }
 0x425   :  { %1306 = vsyncpa [#allocation4], 1 }

</bundles_post_ra>
